<compile_context>
chip_gen: v5e
topology: v5e:2x2
jax: 0.10.0
libtpu: 0.0.40
codegen_flags: <defaults>
</compile_context>

<pallas_src>
import functools

import jax
import jax.numpy as jnp
from jax.experimental import pallas as pl
from jax.experimental.pallas import tpu as pltpu


def _focal_loss_kernel(x_ref, t_ref, out_ref, *, hw):
    # x_ref:   (C, TILE_HW)  logits block — classes on sublanes, spatial on lanes
    # t_ref:   (1, TILE_HW)  int32 target class ids
    # out_ref: (1, TILE_HW)  f32 per-lane partial loss sums for this batch row
    #                        (same block revisited across the HW-tile axis)
    t_idx = pl.program_id(1)

    @pl.when(t_idx == 0)
    def _init():
        out_ref[...] = jnp.zeros_like(out_ref)

    x = x_ref[...].astype(jnp.float32)   # all math in f32 (v5e has no bf16 VPU/EUP)
    tgt = t_ref[...]                     # (1, T) int32
    tile = x.shape[1]

    # Numerically-stable log-softmax over the class (sublane) axis: per-lane ops.
    m = jnp.max(x, axis=0, keepdims=True)                                  # (1, T)
    lse = m + jnp.log(jnp.sum(jnp.exp(x - m), axis=0, keepdims=True))      # (1, T)

    # Gather the target-class logit via a select over the C rows (no dynamic gather).
    cls_ids = jax.lax.broadcasted_iota(jnp.int32, x.shape, 0)              # (C, T)
    x_t = jnp.sum(jnp.where(cls_ids == tgt, x, 0.0), axis=0, keepdims=True)

    # logpt = x_t - lse ; pt = exp(logpt)
    # focal = -(1 - pt)**gamma * logpt   # dead code in the reference (overwritten)
    loss = lse - x_t                                                       # == -logpt

    # Mask the (possibly partial) tail tile instead of padding in HBM.
    lane = jax.lax.broadcasted_iota(jnp.int32, (1, tile), 1)
    valid = (t_idx * tile + lane) < hw
    out_ref[...] += jnp.where(valid, loss, 0.0)


def _pick_tile_hw(hw, c, itemsize):
    """Largest 128-multiple HW tile that keeps the double-buffered pipeline
    (logits + targets + output accumulator, each sublane-padded to >=8 rows)
    inside a conservative VMEM budget (safe on v7x's 64 MiB VMEM)."""
    vmem_budget = 16 * 1024 * 1024
    c_pad = ((c + 7) // 8) * 8
    # per lane-column, double-buffered: logits + int32 targets + f32 accumulator
    bytes_per_lane = 2 * (c_pad * itemsize + 8 * 4 + 8 * 4)
    t = vmem_budget // bytes_per_lane
    t = max(128, (t // 128) * 128)
    return int(hw) if hw <= t else int(t)


def focal_loss(logits, target, gamma=3.0, size_average=True):
    """logits: (N, C, H, W) (or (M, C)); target: integer class ids (N, H, W) (or (M,))."""
    if logits.ndim > 2:
        N, C = logits.shape[0], logits.shape[1]
        x = logits.reshape(N, C, -1)                       # (N, C, HW): free, contiguous
        tgt = target.reshape(N, 1, -1).astype(jnp.int32)   # (N, 1, HW)
    else:
        M, C = logits.shape
        N = 1
        x = jnp.transpose(logits)[None]                    # small 2-D path only
        tgt = target.reshape(1, 1, -1).astype(jnp.int32)
    HW = x.shape[2]
    n_elems = N * HW

    tile_hw = _pick_tile_hw(HW, C, x.dtype.itemsize)
    n_hw_tiles = pl.cdiv(HW, tile_hw)

    kernel = functools.partial(_focal_loss_kernel, hw=HW)

    partials = pl.pallas_call(
        kernel,
        out_shape=jax.ShapeDtypeStruct((N, 1, tile_hw), jnp.float32),
        grid_spec=pltpu.PrefetchScalarGridSpec(
            num_scalar_prefetch=0,
            grid=(N, n_hw_tiles),
            in_specs=[
                pl.BlockSpec((None, C, tile_hw), lambda n, i: (n, 0, i)),
                pl.BlockSpec((None, 1, tile_hw), lambda n, i: (n, 0, i)),
            ],
            out_specs=pl.BlockSpec((None, 1, tile_hw), lambda n, i: (n, 0, 0)),
        ),
        compiler_params=pltpu.CompilerParams(
            dimension_semantics=("parallel", "arbitrary"),
            vmem_limit_bytes=32 * 1024 * 1024,
        ),
    )(x, tgt)

    total = jnp.sum(partials)
    if size_average:
        return total / jnp.float32(n_elems)
    return total


def _reference(logits, target, size_average=True):
    N, C = logits.shape[0], logits.shape[1]
    x = logits.reshape(N, C, -1).transpose(0, 2, 1).reshape(-1, C).astype(jnp.float32)
    t = target.reshape(-1).astype(jnp.int32)
    logp = jax.nn.log_softmax(x, axis=1)
    logpt = jnp.take_along_axis(logp, t[:, None], axis=1)[:, 0]
    loss = -logpt
    return loss.mean() if size_average else loss.sum()


if __name__ == "__main__":
    key = jax.random.PRNGKey(0)
    k1, k2 = jax.random.split(key)

    N, C, H, W = 2, 4, 16, 16
    logits = jax.random.normal(k1, (N, C, H, W), dtype=jnp.float32)
    target = jax.random.randint(k2, (N, H, W), 0, C, dtype=jnp.int32)

    out_mean = focal_loss(logits, target, gamma=3.0, size_average=True)
    out_sum = focal_loss(logits, target, gamma=3.0, size_average=False)
    out_mean, out_sum = jax.block_until_ready((out_mean, out_sum))

    ref_mean = _reference(logits, target, size_average=True)
    ref_sum = _reference(logits, target, size_average=False)
    assert jnp.allclose(out_mean, ref_mean, rtol=1e-5, atol=1e-5), (out_mean, ref_mean)
    assert jnp.allclose(out_sum, ref_sum, rtol=1e-5, atol=1e-4), (out_sum, ref_sum)

    print("KERNEL_OK")
</pallas_src>

<mosaic_0001>
module attributes {stable_mosaic.version = 11 : i64} {
  func.func @_focal_loss_kernel(%arg0: i32, %arg1: i32, %arg2: memref<1x4x256xf32, #tpu.memory_space<vmem>>, %arg3: memref<1x1x256xi32, #tpu.memory_space<vmem>>, %arg4: memref<1x1x256xf32, #tpu.memory_space<vmem>>) attributes {dimension_semantics = [#tpu.dimension_semantics<parallel>, #tpu.dimension_semantics<arbitrary>], iteration_bounds = array<i64: 2, 1>, scalar_prefetch = 0 : i64, scratch_operands = 0 : i64, tpu.core_type = #tpu.core_type<tc>, window_params = [{transform_indices = @transform_0, window_bounds = array<i64: 1, 4, 256>}, {transform_indices = @transform_1, window_bounds = array<i64: 1, 1, 256>}, {transform_indices = @transform_2, window_bounds = array<i64: 1, 1, 256>}]} {
    %c0_i32 = arith.constant 0 : i32
    %0 = arith.cmpi eq, %arg1, %c0_i32 : i32
    %1 = arith.extui %0 : i1 to i32
    %c0_i32_0 = arith.constant 0 : i32
    %2 = arith.cmpi ne, %1, %c0_i32_0 : i32
    scf.if %2 {
      %cst_17 = arith.constant 0.000000e+00 : f32
      %38 = vector.broadcast %cst_17 : f32 to vector<1x256xf32>
      %c0_18 = arith.constant 0 : index
      %c0_19 = arith.constant 0 : index
      %c0_20 = arith.constant 0 : index
      %39 = vector.load %arg4[%c0_18, %c0_19, %c0_20] : memref<1x1x256xf32, #tpu.memory_space<vmem>>, vector<1x1x256xf32>
      %40 = vector.shape_cast %39 : vector<1x1x256xf32> to vector<1x256xf32>
      %41 = vector.shape_cast %38 : vector<1x256xf32> to vector<1x1x256xf32>
      tpu.vector_store %arg4[%c0_18, %c0_19, %c0_20], %41 {strides = array<i32>} : memref<1x1x256xf32, #tpu.memory_space<vmem>>, vector<1x1x256xf32>,
    } else {
    }
    %c0 = arith.constant 0 : index
    %c0_1 = arith.constant 0 : index
    %c0_2 = arith.constant 0 : index
    %3 = vector.load %arg2[%c0, %c0_1, %c0_2] : memref<1x4x256xf32, #tpu.memory_space<vmem>>, vector<1x4x256xf32>
    %4 = vector.shape_cast %3 : vector<1x4x256xf32> to vector<4x256xf32>
    %c0_3 = arith.constant 0 : index
    %c0_4 = arith.constant 0 : index
    %c0_5 = arith.constant 0 : index
    %5 = vector.load %arg3[%c0_3, %c0_4, %c0_5] : memref<1x1x256xi32, #tpu.memory_space<vmem>>, vector<1x1x256xi32>
    %6 = vector.shape_cast %5 : vector<1x1x256xi32> to vector<1x256xi32>
    %cst = arith.constant dense<0xFF800000> : vector<256xf32>
    %7 = vector.multi_reduction <maximumf>, %4, %cst [0] : vector<4x256xf32> to vector<256xf32>
    %8 = vector.shape_cast %7 : vector<256xf32> to vector<1x256xf32>
    %9 = vector.broadcast %8 : vector<1x256xf32> to vector<4x256xf32>
    %10 = arith.subf %4, %9 : vector<4x256xf32>
    %11 = math.exp %10 : vector<4x256xf32>
    %cst_6 = arith.constant dense<0.000000e+00> : vector<256xf32>
    %12 = vector.multi_reduction <add>, %11, %cst_6 [0] : vector<4x256xf32> to vector<256xf32>
    %13 = vector.shape_cast %12 : vector<256xf32> to vector<1x256xf32>
    %14 = math.log %13 : vector<1x256xf32>
    %15 = arith.addf %8, %14 : vector<1x256xf32>
    %16 = tpu.iota {dimensions = array<i32: 0>} : vector<4x256xi32>
    %17 = vector.broadcast %6 : vector<1x256xi32> to vector<4x256xi32>
    %18 = arith.cmpi eq, %16, %17 : vector<4x256xi32>
    %cst_7 = arith.constant 0.000000e+00 : f32
    %19 = vector.broadcast %cst_7 : f32 to vector<4x256xf32>
    %20 = arith.select %18, %4, %19 : vector<4x256xi1>, vector<4x256xf32>
    %cst_8 = arith.constant dense<0.000000e+00> : vector<256xf32>
    %21 = vector.multi_reduction <add>, %20, %cst_8 [0] : vector<4x256xf32> to vector<256xf32>
    %22 = vector.shape_cast %21 : vector<256xf32> to vector<1x256xf32>
    %23 = arith.subf %15, %22 : vector<1x256xf32>
    %24 = tpu.iota {dimensions = array<i32: 1>} : vector<1x256xi32>
    %c256_i32 = arith.constant 256 : i32
    %25 = arith.muli %arg1, %c256_i32 : i32
    %26 = vector.broadcast %25 : i32 to vector<1x256xi32>
    %27 = arith.addi %26, %24 : vector<1x256xi32>
    %c256_i32_9 = arith.constant 256 : i32
    %28 = vector.broadcast %c256_i32_9 : i32 to vector<1x256xi32>
    %29 = arith.cmpi slt, %27, %28 : vector<1x256xi32>
    %c0_10 = arith.constant 0 : index
    %c0_11 = arith.constant 0 : index
    %c0_12 = arith.constant 0 : index
    %30 = vector.load %arg4[%c0_10, %c0_11, %c0_12] : memref<1x1x256xf32, #tpu.memory_space<vmem>>, vector<1x1x256xf32>
    %31 = vector.shape_cast %30 : vector<1x1x256xf32> to vector<1x256xf32>
    %cst_13 = arith.constant 0.000000e+00 : f32
    %32 = vector.broadcast %cst_13 : f32 to vector<1x256xf32>
    %33 = arith.select %29, %23, %32 : vector<1x256xi1>, vector<1x256xf32>
    %34 = arith.addf %31, %33 : vector<1x256xf32>
    %c0_14 = arith.constant 0 : index
    %c0_15 = arith.constant 0 : index
    %c0_16 = arith.constant 0 : index
    %35 = vector.load %arg4[%c0_14, %c0_15, %c0_16] : memref<1x1x256xf32, #tpu.memory_space<vmem>>, vector<1x1x256xf32>
    %36 = vector.shape_cast %35 : vector<1x1x256xf32> to vector<1x256xf32>
    %37 = vector.shape_cast %34 : vector<1x256xf32> to vector<1x1x256xf32>
    tpu.vector_store %arg4[%c0_14, %c0_15, %c0_16], %37 {strides = array<i32>} : memref<1x1x256xf32, #tpu.memory_space<vmem>>, vector<1x1x256xf32>,
    return
  }
  func.func @transform_0(%arg0: i32, %arg1: i32) -> (i32, i32, i32) {
    %c0_i32 = arith.constant 0 : i32
    %c0_i32_0 = arith.constant 0 : i32
    return %arg0, %c0_i32, %arg1 : i32, i32, i32
  }
  func.func @transform_1(%arg0: i32, %arg1: i32) -> (i32, i32, i32) {
    %c0_i32 = arith.constant 0 : i32
    %c0_i32_0 = arith.constant 0 : i32
    return %arg0, %c0_i32, %arg1 : i32, i32, i32
  }
  func.func @transform_2(%arg0: i32, %arg1: i32) -> (i32, i32, i32) {
    %c0_i32 = arith.constant 0 : i32
    %c0_i32_0 = arith.constant 0 : i32
    %c0_i32_1 = arith.constant 0 : i32
    return %arg0, %c0_i32, %c0_i32_0 : i32, i32, i32
  }
}

</mosaic_0001>

<bundles_post_ra>
// kernel: tpu_custom_call.1
= control target key start
LH: loop header
LB: loop body
LE: loop exit
PB: predicated region body
PF: predicated region fallthrough
CT: control target
= control target key end

     0   :  { %7 = vsyncpa [#allocation3], 0  ;;  %s882_s0 = inlined_call_operand.hbm [shape: f32[2,4,256], index: 0, kind: input, shape index: {}]   ;;  %s883_s1 = inlined_call_operand.hbm [shape: s32[2,1,256], index: 1, kind: input, shape index: {}]   ;;  %s884_s2 = inlined_call_operand.hbm [shape: f32[2,1,256], index: 2, kind: output, shape index: {}]  }
   0x1   :  { %9 = vsyncpa [#allocation3 + $0x1], 0 }
   0x2   :  { %10 = vsyncpa [#allocation6], 0 }
   0x3   :  { %12 = vsyncpa [#allocation6 + $0x1], 0 }
   0x4   :  { %13 = vsyncpa [#allocation4], 0 }
   0x5   :  { %15 = vsyncpa [#allocation4 + $0x1], 0  ;;  %s720_s9 = smov 0   ;;  %s722_s10 = smov 0  }
   0x6   :  { %s724_s11 = smov 0   ;;  %s726_s12 = smov 0  }
   0x7   :  { %s728_s13 = smov 0   ;;  %s730_s14 = smov 0  }
   0x8 LB: > { %s464_s15 = sadd.s32 4294967295, %s702_s14   ;;  %s465_s16 = sadd.s32 4294967294, %s702_s14   ;;  %s702_s14 = sphi %s730_s14, %s21_s14   ;;  %s698_s13 = sphi %s728_s13, %s896_s13   ;;  %s694_s12 = sphi %s726_s12, %s895_s12   ;;  %s690_s11 = sphi %s724_s11, %s894_s11   ;;  %s686_s10 = sphi %s722_s10, %s893_s10   ;;  %s682_s9 = sphi %s720_s9, %s892_s9  }
   0x9   : > { %s33_s17 = sadd.s32 1, %s698_s13  ;;  %s42_s18 = sadd.s32 1, %s690_s11 }
   0xa   : > { %p35_p0 = scmp.ge.s32.totalorder %s33_s17, 2  ;;  %p49_p1 = scmp.ne.s32.totalorder %s690_s11, %s686_s10 }
   0xb   : > { %p50_p2 = scmp.eq.s32.totalorder %s702_s14, 0  ;;  %p55_p3 = scmp.ne.s32.totalorder %s686_s10, %s682_s9 }
   0xc   : > { %s898_s17 = smov (%p35_p0, %s33_s17), 0  ;;  %p56_p5 = scmp.eq.s32.totalorder %s464_s15, 0 }
   0xd   : > { %p761_p4 = por %p50_p2, %p49_p1  ;;  %s37_s20 = ssub.s32 %s698_s13, %s898_s17 }
   0xe   : > { %p107_p6 = scmp.eq.s32.totalorder %s464_s15, 1  ;;  %p40_p7 = scmp.eq.s32.totalorder %s37_s20, 0 }
   0xf   : > { %p767_p8 = por %p56_p5, %p55_p3  ;;  %p113_p10 = scmp.eq.s32.totalorder %s465_s16, 1 }
  0x10   : > { %p771_p9 = por %p107_p6, %p49_p1  ;;  %p467_p12 = scmp.ge.s32.totalorder %s702_s14, 2 }
  0x11   : > { %s776_s23 = scalar_select %p40_p7, %s690_s11, %s42_s18  }
  0x12   : > { %p778_p11 = por %p113_p10, %p55_p3  ;;  %p499_p13 = scmp.lt.s32.totalorder %s702_s14, 2 }
  0x13   : > { %s133_s25 = sand.u32 1, %s690_s11   ;;  %s481_s27 = sshll.u32 %s698_s13, 3 }
  0x14   : > { %s468_s26 = sshll.u32 %s133_s25, 3  ;;  %s144_s30 = scalar_lea.hbm %s882_s0, %s481_s27 }
  0x15   : > { %s137_s3 = scalar_lea.vmem [#allocation2], %s468_s26  ;;  %s146_s5 = sshll.u32 %s144_s30, 4  ;;  %s147_s5 = int_to_ptr.hbm [resolvable:$true] %s146_s5 }
  0x16   : > { %s148_s4 = sshll.u32 %s137_s3, 4  ;;  %p791_p0 = pnand %p499_p13, %p761_p4  ;;  %s149_s4 = int_to_ptr.vmem [resolvable:$true] %s148_s4 }
  0x17   : > { %p473_p1 = scmp.ge.s32.totalorder %s702_s14, 1  ;;  %p174_p2 = scmp.lt.s32.totalorder %s702_s14, 3 }
  0x18   : > { %s134_s7 = scalar_lea.sflag [#allocation3], %s133_s25  ;;  %s471_s8 = sshll.u32 %s133_s25, 1 }
  0x19   : > { %491 = dma.hbm_to_vmem [thread:$0]  (!%p791_p0), %s147_s5, 128, %s149_s4, %s134_s7  }
  0x1a   : > { %p175_p3 = pnand %p473_p1, %p174_p2  ;;  %s472_s15 = sshll.u32 %s698_s13, 1 }
  0x1b   : > { %s165_s20 = scalar_lea.hbm %s883_s1, %s472_s15  ;;  %s159_s26 = scalar_lea.vmem [#allocation5], %s471_s8 }
  0x1c   : > { %s169_s19 = sshll.u32 %s159_s26, 4  ;;  %s167_s27 = sshll.u32 %s165_s20, 4  ;;  %s170_s19 = int_to_ptr.vmem [resolvable:$true] %s169_s19  ;;  %s168_s27 = int_to_ptr.hbm [resolvable:$true] %s167_s27 }
  0x1d   : > { %s156_s28 = scalar_lea.sflag [#allocation6], %s133_s25  ;;  %178 = sbr.rel (%p175_p3) target bundleno = 117 (0x75), region = 28 }
  0x1e   : > { %494 = dma.hbm_to_vmem [thread:$0]  (!%p791_p0), %s168_s27, 32, %s170_s19, %s156_s28  }
  0x1f   : > { %s806_s29 = sand.u32 (!%p175_p3), 1, %s686_s10  }
  0x20   : > { %s474_s30 = sshll.u32 (!%p175_p3), %s806_s29, 3  ;;  %s181_s3 = scalar_lea.sflag (!%p175_p3), [#allocation3], %s806_s29 }
  0x21   : > { %s184_s4 = scalar_lea.vmem (!%p175_p3), [#allocation2], %s474_s30 }
  0x22   : > { %669 = dma.done.wait (%p767_p8), %s181_s3, 128  }
  0x23   : > { %671 = vsyncadd (%p767_p8), %s181_s3, 4294967168  ;;  %s475_s25 = sshll.u32 %s806_s29, 1  ;;  %s191_s5 = scalar_lea.sflag [#allocation6], %s806_s29 }
  0x24   : > { %s816_s6 = scalar_lea.vmem [#allocation5], %s475_s25 }
  0x25   : > { %673 = dma.done.wait (%p767_p8), %s191_s5, 32  }
  0x26   : > { %675 = vsyncadd (%p767_p8), %s191_s5, 4294967264  ;;  %v232_v0 = vld [vmem:[%s184_s4] sm:$0xff]  ;;  %vm240_vm0 = vcmask 1043456   ;;  %v227_v19 = vlaneseq  ;;  %s829_s21 = scalar_lea.vmem [#allocation7], %s475_s25  ;;  %v704_v23 = vmov 0.0   ;;  %s478_s7 = sshll.u32 %s694_s12, 1 }
  0x27   : > { %235 = vst [vmem:[#allocation1] ss:$2 sm:$0xff] %v232_v0  ;;  %v233_v25 = vld [vmem:[%s816_s6] sm:$0x3]  ;;  %s353_s16 = scalar_lea.hbm %s884_s2, %s478_s7  ;;  %vm333_vm4 = vcmask 1040384   ;;  %s355_s18 = sshll.u32 %s829_s21, 4  ;;  %s356_s18 = int_to_ptr.vmem [resolvable:$true] %s355_s18 }
  0x28   : > { %vm825_vm1 = vcmp.lt.s32.totalorder %v227_v19, 256  ;;  %v290_v30 = vshrl.u32 %v227_v19, 7  ;;  %v291_v33 = vperm.slane %v233_v25, 0  ;;  %v292_v34 = vperm.slane %v233_v25, 1  ;;  %s357_s20 = sshll.u32 %s353_s16, 4  ;;  %s343_s12 = scalar_lea.sflag [#allocation4], %s806_s29  ;;  %s358_s20 = int_to_ptr.hbm [resolvable:$true] %s357_s20 }
  0x29   : > { %231 = vst.msk [vmem:[%s829_s21] sm:$0x3] %vm825_vm1, %v704_v23  ;;  %s630_s26 = sshra.s32 %s358_s20, 4  ;;  %s636_s30 = scalar_lea.hbm %s884_s2, 4  ;;  %s631_s26 = int_to_ptr.hbm [resolvable:$true] %s630_s26 }
  0x2a   : > { %vm293_vm2 = vcmp.eq.s32.totalorder %v290_v30, %v291_v33  ;;  %vm294_vm3 = vcmp.eq.s32.totalorder %v290_v30, %v292_v34  ;;  %s632_s19 = scalar_lea.hbm %s631_s26, 2  ;;  %p637_p7 = scmp.lt.s32.totalorder %s631_s26, %s884_s2 }
  0x2b   : > { %p633_p4 = scmp.ne.s32.totalorder %s631_s26, %s632_s19  ;;  %p638_p8 = scmp.lt.s32.totalorder %s636_s30, %s632_s19 }
  0x2d   : > { %p634_p5 = pnand %p633_p4, %p771_p9  ;;  %p639_p10 = por %p638_p8, %p637_p7 }
  0x2e   : > { %v236_v1 = vld.sshfl [vmem:[#allocation1] sm:$0xff pattern:$0x75316420]  ;;  %v237_v2 = vld.sshfl [vmem:[#allocation1 + $0x8] sm:$0xff pattern:$0x75316420] }
  0x2f   : > { %v241_v3 = vsel %vm240_vm0, %v236_v1, -inf  ;;  %v248_v4 = vsel %vm240_vm0, %v237_v2, -inf  ;;  %p635_p6 = pneg %p634_p5 }
  0x30   : > { %v242_v5 = vrot.slane %v241_v3, 4  ;;  %v249_v6 = vrot.slane %v248_v4, 4 }
  0x31   : > { %p640_p13 = pnand %p639_p10, %p635_p6 }
  0x32   : > { %v243_v7 = vmax.f32 %v241_v3, %v242_v5  ;;  %v250_v8 = vmax.f32 %v248_v4, %v249_v6 }
  0x34   : > { %v244_v9 = vrot.slane %v243_v7, 2  ;;  %v251_v10 = vrot.slane %v250_v8, 2 }
  0x36   : > { %v245_v11 = vmax.f32 %v243_v7, %v244_v9  ;;  %v252_v12 = vmax.f32 %v250_v8, %v251_v10  ;;  %v327_v7 = vld [vmem:[%s829_s21] sm:$0x3] }
  0x38   : > { %v246_v13 = vrot.slane %v245_v11, 1  ;;  %v253_v14 = vrot.slane %v252_v12, 1 }
  0x3a   : > { %v254_v15 = vmax.f32 %v252_v12, %v253_v14  ;;  %v247_v16 = vmax.f32 %v245_v11, %v246_v13 }
  0x3c   : > { %v257_v17 = vrot.slane %v254_v15, 4 }
  0x3e   : > { %v258_v18 = vsel %vm240_vm0, %v247_v16, %v257_v17 }
  0x3f   : > { %v260_v20 = vsub.f32 %v232_v0, %v258_v18 }
  0x41   : > { %v261_v22 = vmul.f32 1.442695, %v260_v20 }
  0x43   : > { %550 = vpow2.f32 %v261_v22 }
  0x49   : > { %v551_v24 = vpop.eup %550 }
  0x4a   : > { %264 = vst [vmem:[#allocation1] ss:$2 sm:$0xff] %v551_v24 }
  0x51   : > { %v265_v26 = vld.sshfl [vmem:[#allocation1] sm:$0xff pattern:$0x75316420]  ;;  %v266_v27 = vld.sshfl [vmem:[#allocation1 + $0x8] sm:$0xff pattern:$0x75316420] }
  0x52   : > { %v269_v28 = vsel %vm240_vm0, %v265_v26, 0.0  ;;  %v276_v29 = vsel %vm240_vm0, %v266_v27, 0.0  ;;  %295 = vst [vmem:[#allocation1] ss:$2 sm:$0xff] %v232_v0 }
  0x53   : > { %v270_v31 = vrot.slane %v269_v28, 4  ;;  %v277_v32 = vrot.slane %v276_v29, 4 }
  0x55   : > { %v271_v35 = vadd.f32 %v270_v31, %v269_v28  ;;  %v278_v36 = vadd.f32 %v277_v32, %v276_v29 }
  0x57   : > { %v272_v37 = vrot.slane %v271_v35, 2  ;;  %v279_v38 = vrot.slane %v278_v36, 2 }
  0x59   : > { %v273_v39 = vadd.f32 %v272_v37, %v271_v35  ;;  %v280_v40 = vadd.f32 %v279_v38, %v278_v36  ;;  %v296_v41 = vld.sshfl [vmem:[#allocation1] sm:$0xff pattern:$0x75316420]  ;;  %v297_v42 = vld.sshfl [vmem:[#allocation1 + $0x8] sm:$0xff pattern:$0x75316420] }
  0x5a   : > { %v300_v43 = vsel %vm293_vm2, %v296_v41, 0.0  ;;  %v301_v44 = vsel %vm294_vm3, %v297_v42, 0.0 }
  0x5b   : > { %v274_v45 = vrot.slane %v273_v39, 1  ;;  %v281_v46 = vrot.slane %v280_v40, 1  ;;  %v302_v47 = vsel %vm240_vm0, %v300_v43, 0.0  ;;  %v309_v48 = vsel %vm240_vm0, %v301_v44, 0.0 }
  0x5c   : > { %v303_v49 = vrot.slane %v302_v47, 4  ;;  %v310_v50 = vrot.slane %v309_v48, 4 }
  0x5d   : > { %v275_v51 = vadd.f32 %v274_v45, %v273_v39  ;;  %v282_v52 = vadd.f32 %v281_v46, %v280_v40 }
  0x5e   : > { %v304_v53 = vadd.f32 %v303_v49, %v302_v47  ;;  %v311_v54 = vadd.f32 %v310_v50, %v309_v48 }
  0x5f   : > { %552 = vlog2.f32 %v275_v51 }
  0x60   : > { %554 = vlog2.f32 %v282_v52  ;;  %v305_v55 = vrot.slane %v304_v53, 2  ;;  %v312_v56 = vrot.slane %v311_v54, 2 }
  0x62   : > { %v313_v57 = vadd.f32 %v312_v56, %v311_v54  ;;  %v306_v58 = vadd.f32 %v305_v55, %v304_v53 }
  0x64   : > { %v314_v60 = vrot.slane %v313_v57, 1  ;;  %v307_v0 = vrot.slane %v306_v58, 1 }
  0x65   : > { %v553_v59 = vpop.eup %552 }
  0x66   : > { %v555_v61 = vpop.eup %554  ;;  %v284_v62 = vmul.f32 0.6931472, %v553_v59  ;;  %v315_v3 = vadd.f32 %v314_v60, %v313_v57  ;;  %v308_v4 = vadd.f32 %v307_v0, %v306_v58 }
  0x67   : > { %v286_v63 = vmul.f32 0.6931472, %v555_v61 }
  0x68   : > { %v287_v1 = vadd.f32 %v284_v62, %v247_v16 }
  0x69   : > { %v288_v2 = vadd.f32 %v286_v63, %v254_v15 }
  0x6a   : > { %v316_v6 = vsub.f32 %v287_v1, %v308_v4 }
  0x6b   : > { %v317_v5 = vsub.f32 %v288_v2, %v315_v3 }
  0x6d   : > { %v332_v8 = vrot.slane %v317_v5, 7 }
  0x6f   : > { %v334_v9 = vsel %vm333_vm4, %v316_v6, %v332_v8 }
  0x70   : > { %v336_v10 = vadd.f32 %v334_v9, %v327_v7 }
  0x72   : > { %341 = vst.msk [vmem:[%s829_s21] sm:$0x3] %vm825_vm1, %v336_v10 }
  0x73   : > { %643 = shalt.err (!%p640_p13)
}
  0x74   : > { %486 = dma.vmem_to_hbm [thread:$0]  (%p771_p9), %s356_s18, 32, %s358_s20, %s343_s12  }
  0x75 PF: > { %s369_s29 = sand.u32 1, %s682_s9   ;;  %p496_p0 = pnand %p467_p12, %p778_p11 }
  0x76   : > { %s370_s25 = scalar_lea.sflag [#allocation4], %s369_s29 }
  0x77   : > { %p497_p1 = pneg %p496_p0 }
  0x79   : > { %677 = dma.done.wait (%p497_p1), %s370_s25, 32  }
  0x7a   : > { %679 = vsyncadd (%p497_p1), %s370_s25, 4294967264  ;;  %s21_s14 = sadd.s32 1, %s702_s14   ;;  %s892_s9 = smov %s686_s10 }
  0x7b   : > { %p18_p2 = scmp.ge.s32.totalorder %s21_s14, 4   ;;  %s893_s10 = smov %s690_s11 }
  0x7c   : > { %s894_s11 = smov %s776_s23  ;;  %s895_s12 = smov %s698_s13 }
  0x7d   : > { %s896_s13 = smov %s898_s17  ;;  %20 = sbr.rel (!%p18_p2) target bundleno = 8 (0x8), region = 90 }
  0x82   :  { %376 = vsyncpa [#allocation3], 1 }
  0x83   :  { %378 = vsyncpa [#allocation3 + $0x1], 1 }
  0x84   :  { %379 = vsyncpa [#allocation6], 1 }
  0x85   :  { %381 = vsyncpa [#allocation6 + $0x1], 1 }
  0x86   :  { %382 = vsyncpa [#allocation4], 1 }
  0x87   :  { %384 = vsyncpa [#allocation4 + $0x1], 1 }

</bundles_post_ra>
